<compile_context>
chip_gen: v7x
topology: tpu7x:2x2x1
jax: 0.10.0
libtpu: 0.0.40
codegen_flags: <defaults>
</compile_context>

<pallas_src>
import functools

import jax
import jax.numpy as jnp
from jax.experimental import pallas as pl
from jax.experimental.pallas import tpu as pltpu


def _input_conv_kernel(x_ref, w1_ref, b1_ref, w2_ref, b2_ref, w3_ref, b3_ref,
                       o_ref, *, compute_dtype):
    # x_ref: (C_in, tm) tile of pixels (channels on sublanes, pixels on lanes).
    # Weights are raw squeezed Conv2d weights (C_out_l, C_in_l); biases (C_out_l, 1).
    x = x_ref[...].astype(compute_dtype)

    w1 = w1_ref[...].astype(compute_dtype)
    h1 = jnp.dot(w1, x, preferred_element_type=jnp.float32)          # (H1, tm)
    h1 = jnp.maximum(h1 + b1_ref[...], 0.0).astype(compute_dtype)    # ReLU (+ Dropout(0) = id)

    w2 = w2_ref[...].astype(compute_dtype)
    h2 = jnp.dot(w2, h1, preferred_element_type=jnp.float32)         # (H2, tm)
    h2 = jnp.maximum(h2 + b2_ref[...], 0.0).astype(compute_dtype)    # ReLU (+ Dropout(0) = id)

    w3 = w3_ref[...].astype(compute_dtype)
    out = jnp.dot(w3, h2, preferred_element_type=jnp.float32)        # (C_out, tm)
    out = out + b3_ref[...]

    # Lane-dense store: last dim is the pixel tile (multiple of 128).
    o_ref[...] = out.astype(o_ref.dtype)


def _pick_pixel_tile(hw, target):
    """Largest multiple of 128 that divides hw and is <= target; else the full row."""
    t = (min(target, hw) // 128) * 128
    while t >= 128:
        if hw % t == 0:
            return t
        t -= 128
    return hw  # full extent is always a legal last-dim block


def input_conv_forward(x_nchw, params, *, tm_target=1024,
                       compute_dtype=jnp.float32):
    """x_nchw: [B, C_in, H, W]. Returns [B, C_out, H, W].

    params: (w1, b1, w2, b2, w3, b3) with w_i of shape (C_out_i, C_in_i)
    (the squeezed Conv2d weight) and b_i of shape (C_out_i, 1).
    """
    w1, b1, w2, b2, w3, b3 = params
    B, C_in, H, W = x_nchw.shape
    H1, H2, C_out = w1.shape[0], w2.shape[0], w3.shape[0]
    HW = H * W

    # Zero-copy channels-major view: NCHW is already (B, C, H*W) contiguous.
    x_cm = x_nchw.reshape(B, C_in, HW)

    tm = _pick_pixel_tile(HW, tm_target)
    # v7x has 2 TensorCores: keep at least 2 parallel grid steps when possible.
    if B * (HW // tm) < 2 and tm > 128 and tm % 2 == 0 \
            and HW % (tm // 2) == 0 and (tm // 2) % 128 == 0:
        tm //= 2
    n_pix_tiles = HW // tm

    full = lambda b, i: (0, 0)  # weights / biases: same (only) block each step
    # Note: constant-index weight specs still get default double-buffering; at
    # these sizes (<< 100 KiB total) the extra VMEM/DMA cost is negligible, so we
    # skip pl.Buffered(1) to keep the lowering maximally portable.

    itemsize = jnp.dtype(x_nchw.dtype).itemsize
    n_rows = B * HW
    cost = pl.CostEstimate(
        flops=2 * n_rows * (C_in * H1 + H1 * H2 + H2 * C_out),
        transcendentals=0,
        bytes_accessed=n_rows * (C_in + C_out) * itemsize
        + sum(int(p.size) * jnp.dtype(p.dtype).itemsize for p in params),
    )

    kernel = functools.partial(_input_conv_kernel, compute_dtype=compute_dtype)

    out_cm = pl.pallas_call(
        kernel,
        out_shape=jax.ShapeDtypeStruct((B, C_out, HW), x_nchw.dtype),
        grid_spec=pltpu.PrefetchScalarGridSpec(
            num_scalar_prefetch=0,
            grid=(B, n_pix_tiles),
            in_specs=[
                # x: (batch squeezed, full channels, pixel tile) -> kernel sees (C_in, tm)
                pl.BlockSpec((None, C_in, tm), lambda b, i: (b, 0, i)),
                pl.BlockSpec(w1.shape, full),
                pl.BlockSpec(b1.shape, full),
                pl.BlockSpec(w2.shape, full),
                pl.BlockSpec(b2.shape, full),
                pl.BlockSpec(w3.shape, full),
                pl.BlockSpec(b3.shape, full),
            ],
            out_specs=pl.BlockSpec((None, C_out, tm), lambda b, i: (b, 0, i)),
        ),
        compiler_params=pltpu.CompilerParams(
            dimension_semantics=("parallel", "parallel"),
            # Portable scoped-VMEM budget: above v5e's 16 MiB default, within
            # v6e's 128 MiB and v7x's 64 MiB physical VMEM.
            vmem_limit_bytes=32 * 1024 * 1024,
        ),
        cost_estimate=cost,
    )(x_cm, w1, b1, w2, b2, w3, b3)

    # (B, C_out, H*W) -> NCHW, zero-copy reshape.
    return out_cm.reshape(B, C_out, H, W)


def init_params(key, in_channels=16, hidden_dims=(64, 128), out_channels=14,
                dtype=jnp.float32):
    """Deterministic init matching PyTorch Conv2d default U(-k, k), k = 1/sqrt(fan_in).

    Weight layout is (C_out, C_in) — the raw Conv2d weight [out, in, 1, 1]
    squeezed — and bias layout is (C_out, 1), so y = W @ x + b in channels-major
    form matches the conv.
    """
    dims = [in_channels, *hidden_dims, out_channels]
    params = []
    for i in range(len(dims) - 1):
        cin, cout = dims[i], dims[i + 1]
        key, kw, kb = jax.random.split(key, 3)
        bound = 1.0 / (cin ** 0.5)
        w = jax.random.uniform(kw, (cout, cin), dtype, -bound, bound)
        b = jax.random.uniform(kb, (cout, 1), dtype, -bound, bound)
        params.extend([w, b])
    return tuple(params)


def reference_forward(x_nchw, params):
    """Pure-JAX reference of the PyTorch module (1x1 convs as channel matmuls)."""
    w1, b1, w2, b2, w3, b3 = params
    B, C, H, W = x_nchw.shape
    x = x_nchw.reshape(B, C, H * W)
    h = jnp.maximum(jnp.einsum('oc,bcn->bon', w1, x) + b1[None], 0.0)
    h = jnp.maximum(jnp.einsum('oc,bcn->bon', w2, h) + b2[None], 0.0)
    y = jnp.einsum('oc,bcn->bon', w3, h) + b3[None]
    return y.reshape(B, -1, H, W)


if __name__ == "__main__":
    key = jax.random.PRNGKey(0)
    kx, kp = jax.random.split(key)

    # Small shapes consistent with the module defaults (in=16, out=14).
    B, C_in, H, W = 2, 16, 16, 16
    x = jax.random.normal(kx, (B, C_in, H, W), dtype=jnp.float32)
    params = init_params(kp, in_channels=C_in, hidden_dims=(64, 128),
                         out_channels=14)

    out = input_conv_forward(x, params)
    out = jax.block_until_ready(out)

    ref = reference_forward(x, params)
    assert out.shape == (B, 14, H, W), out.shape
    assert jnp.allclose(out, ref, atol=1e-4, rtol=1e-4), "mismatch vs reference"

    print("KERNEL_OK")
</pallas_src>

<mosaic_0001>
module attributes {stable_mosaic.version = 11 : i64} {
  func.func @_input_conv_kernel(%arg0: i32, %arg1: i32, %arg2: memref<1x16x256xf32, #tpu.memory_space<vmem>>, %arg3: memref<64x16xf32, #tpu.memory_space<vmem>>, %arg4: memref<64x1xf32, #tpu.memory_space<vmem>>, %arg5: memref<128x64xf32, #tpu.memory_space<vmem>>, %arg6: memref<128x1xf32, #tpu.memory_space<vmem>>, %arg7: memref<14x128xf32, #tpu.memory_space<vmem>>, %arg8: memref<14x1xf32, #tpu.memory_space<vmem>>, %arg9: memref<1x14x256xf32, #tpu.memory_space<vmem>>) attributes {dimension_semantics = [#tpu.dimension_semantics<parallel>, #tpu.dimension_semantics<parallel>], iteration_bounds = array<i64: 2, 1>, scalar_prefetch = 0 : i64, scratch_operands = 0 : i64, tpu.core_type = #tpu.core_type<tc>, window_params = [{transform_indices = @transform_0, window_bounds = array<i64: 1, 16, 256>}, {pipeline_mode = #tpu.pipeline_mode<synchronous>, transform_indices = @transform_1, window_bounds = array<i64: 64, 16>}, {pipeline_mode = #tpu.pipeline_mode<synchronous>, transform_indices = @transform_2, window_bounds = array<i64: 64, 1>}, {pipeline_mode = #tpu.pipeline_mode<synchronous>, transform_indices = @transform_3, window_bounds = array<i64: 128, 64>}, {pipeline_mode = #tpu.pipeline_mode<synchronous>, transform_indices = @transform_4, window_bounds = array<i64: 128, 1>}, {pipeline_mode = #tpu.pipeline_mode<synchronous>, transform_indices = @transform_5, window_bounds = array<i64: 14, 128>}, {pipeline_mode = #tpu.pipeline_mode<synchronous>, transform_indices = @transform_6, window_bounds = array<i64: 14, 1>}, {transform_indices = @transform_7, window_bounds = array<i64: 1, 14, 256>}]} {
    %c0 = arith.constant 0 : index
    %c0_0 = arith.constant 0 : index
    %c0_1 = arith.constant 0 : index
    %0 = vector.load %arg2[%c0, %c0_0, %c0_1] : memref<1x16x256xf32, #tpu.memory_space<vmem>>, vector<1x16x256xf32>
    %1 = vector.shape_cast %0 : vector<1x16x256xf32> to vector<16x256xf32>
    %c0_2 = arith.constant 0 : index
    %c0_3 = arith.constant 0 : index
    %2 = vector.load %arg3[%c0_2, %c0_3] : memref<64x16xf32, #tpu.memory_space<vmem>>, vector<64x16xf32>
    %cst = arith.constant dense<0.000000e+00> : vector<64x256xf32>
    %3 = tpu.matmul %2, %1, %cst {dimension_numbers = #tpu.dot_dimension_numbers<[1], [0], [0], [1], [0, 0, 1, 1], [], []>} : vector<64x16xf32>, vector<16x256xf32>, vector<64x256xf32> -> vector<64x256xf32>
    %c0_4 = arith.constant 0 : index
    %c0_5 = arith.constant 0 : index
    %4 = vector.load %arg4[%c0_4, %c0_5] : memref<64x1xf32, #tpu.memory_space<vmem>>, vector<64x1xf32>
    %5 = vector.broadcast %4 : vector<64x1xf32> to vector<64x256xf32>
    %6 = arith.addf %3, %5 : vector<64x256xf32>
    %cst_6 = arith.constant 0.000000e+00 : f32
    %7 = vector.broadcast %cst_6 : f32 to vector<64x256xf32>
    %8 = arith.maximumf %6, %7 : vector<64x256xf32>
    %c0_7 = arith.constant 0 : index
    %c0_8 = arith.constant 0 : index
    %9 = vector.load %arg5[%c0_7, %c0_8] : memref<128x64xf32, #tpu.memory_space<vmem>>, vector<128x64xf32>
    %cst_9 = arith.constant dense<0.000000e+00> : vector<128x256xf32>
    %10 = tpu.matmul %9, %8, %cst_9 {dimension_numbers = #tpu.dot_dimension_numbers<[1], [0], [0], [1], [0, 0, 1, 1], [], []>} : vector<128x64xf32>, vector<64x256xf32>, vector<128x256xf32> -> vector<128x256xf32>
    %c0_10 = arith.constant 0 : index
    %c0_11 = arith.constant 0 : index
    %11 = vector.load %arg6[%c0_10, %c0_11] : memref<128x1xf32, #tpu.memory_space<vmem>>, vector<128x1xf32>
    %12 = vector.broadcast %11 : vector<128x1xf32> to vector<128x256xf32>
    %13 = arith.addf %10, %12 : vector<128x256xf32>
    %cst_12 = arith.constant 0.000000e+00 : f32
    %14 = vector.broadcast %cst_12 : f32 to vector<128x256xf32>
    %15 = arith.maximumf %13, %14 : vector<128x256xf32>
    %c0_13 = arith.constant 0 : index
    %c0_14 = arith.constant 0 : index
    %16 = vector.load %arg7[%c0_13, %c0_14] : memref<14x128xf32, #tpu.memory_space<vmem>>, vector<14x128xf32>
    %cst_15 = arith.constant dense<0.000000e+00> : vector<14x256xf32>
    %17 = tpu.matmul %16, %15, %cst_15 {dimension_numbers = #tpu.dot_dimension_numbers<[1], [0], [0], [1], [0, 0, 1, 1], [], []>} : vector<14x128xf32>, vector<128x256xf32>, vector<14x256xf32> -> vector<14x256xf32>
    %c0_16 = arith.constant 0 : index
    %c0_17 = arith.constant 0 : index
    %18 = vector.load %arg8[%c0_16, %c0_17] : memref<14x1xf32, #tpu.memory_space<vmem>>, vector<14x1xf32>
    %19 = vector.broadcast %18 : vector<14x1xf32> to vector<14x256xf32>
    %20 = arith.addf %17, %19 : vector<14x256xf32>
    %c0_18 = arith.constant 0 : index
    %c0_19 = arith.constant 0 : index
    %c0_20 = arith.constant 0 : index
    %21 = vector.load %arg9[%c0_18, %c0_19, %c0_20] : memref<1x14x256xf32, #tpu.memory_space<vmem>>, vector<1x14x256xf32>
    %22 = vector.shape_cast %21 : vector<1x14x256xf32> to vector<14x256xf32>
    %23 = vector.shape_cast %20 : vector<14x256xf32> to vector<1x14x256xf32>
    tpu.vector_store %arg9[%c0_18, %c0_19, %c0_20], %23 {strides = array<i32>} : memref<1x14x256xf32, #tpu.memory_space<vmem>>, vector<1x14x256xf32>,
    return
  }
  func.func @transform_0(%arg0: i32, %arg1: i32) -> (i32, i32, i32) {
    %c0_i32 = arith.constant 0 : i32
    %c0_i32_0 = arith.constant 0 : i32
    return %arg0, %c0_i32, %arg1 : i32, i32, i32
  }
  func.func @transform_1(%arg0: i32, %arg1: i32) -> (i32, i32) {
    %c0_i32 = arith.constant 0 : i32
    %c0_i32_0 = arith.constant 0 : i32
    %c0_i32_1 = arith.constant 0 : i32
    return %c0_i32, %c0_i32_0 : i32, i32
  }
  func.func @transform_2(%arg0: i32, %arg1: i32) -> (i32, i32) {
    %c0_i32 = arith.constant 0 : i32
    %c0_i32_0 = arith.constant 0 : i32
    %c0_i32_1 = arith.constant 0 : i32
    return %c0_i32, %c0_i32_0 : i32, i32
  }
  func.func @transform_3(%arg0: i32, %arg1: i32) -> (i32, i32) {
    %c0_i32 = arith.constant 0 : i32
    %c0_i32_0 = arith.constant 0 : i32
    %c0_i32_1 = arith.constant 0 : i32
    return %c0_i32, %c0_i32_0 : i32, i32
  }
  func.func @transform_4(%arg0: i32, %arg1: i32) -> (i32, i32) {
    %c0_i32 = arith.constant 0 : i32
    %c0_i32_0 = arith.constant 0 : i32
    %c0_i32_1 = arith.constant 0 : i32
    return %c0_i32, %c0_i32_0 : i32, i32
  }
  func.func @transform_5(%arg0: i32, %arg1: i32) -> (i32, i32) {
    %c0_i32 = arith.constant 0 : i32
    %c0_i32_0 = arith.constant 0 : i32
    %c0_i32_1 = arith.constant 0 : i32
    return %c0_i32, %c0_i32_0 : i32, i32
  }
  func.func @transform_6(%arg0: i32, %arg1: i32) -> (i32, i32) {
    %c0_i32 = arith.constant 0 : i32
    %c0_i32_0 = arith.constant 0 : i32
    %c0_i32_1 = arith.constant 0 : i32
    return %c0_i32, %c0_i32_0 : i32, i32
  }
  func.func @transform_7(%arg0: i32, %arg1: i32) -> (i32, i32, i32) {
    %c0_i32 = arith.constant 0 : i32
    %c0_i32_0 = arith.constant 0 : i32
    return %arg0, %c0_i32, %arg1 : i32, i32, i32
  }
}

</mosaic_0001>

<bundles_post_ra>
// kernel: tpu_custom_call.1
= control target key start
LH: loop header
LB: loop body
LE: loop exit
PB: predicated region body
PF: predicated region fallthrough
CT: control target
= control target key end

     0   :  { %s1251_s24 = smov 0   ;;  %s1253_s25 = smov 0   ;;  %s1497_s0 = inlined_call_operand.vmem [shape: f32[2,16,256], index: 0, kind: input, shape index: {}]   ;;  %s1498_s1 = inlined_call_operand.vmem [shape: f32[64,16], index: 1, kind: input, shape index: {}]   ;;  %s1499_s2 = inlined_call_operand.vmem [shape: f32[64,1], index: 2, kind: input, shape index: {}]   ;;  %s1500_s3 = inlined_call_operand.vmem [shape: f32[128,64], index: 3, kind: input, shape index: {}]   ;;  %s1501_s4 = inlined_call_operand.vmem [shape: f32[128,1], index: 4, kind: input, shape index: {}]   ;;  %s1502_s5 = inlined_call_operand.vmem [shape: f32[14,128], index: 5, kind: input, shape index: {}]   ;;  %s1503_s6 = inlined_call_operand.vmem [shape: f32[14,1], index: 6, kind: input, shape index: {}]   ;;  %s1504_s7 = inlined_call_operand.vmem [shape: f32[2,14,256], index: 7, kind: output, shape index: {}]  }
   0x1   :  { %s1255_s26 = smov 0  }
   0x2 LB: > { %s29_s27 = sadd.s32 1, %s1203_s25  ;;  %p1072_p0 = scmp.ge.s32.totalorder %s1207_s26, 1  ;;  %s1207_s26 = sphi %s1255_s26, %s17_s26   ;;  %s1203_s25 = sphi %s1253_s25, %s1506_s25   ;;  %s1199_s24 = sphi %s1251_s24, %s1505_s24  }
   0x3   : > { %p31_p1 = scmp.ge.s32.totalorder %s29_s27, 2  ;;  %p258_p2 = scmp.lt.s32.totalorder %s1207_s26, 3 }
   0x5   : > { %s1508_s27 = smov (%p31_p1, %s29_s27), 0  ;;  %p259_p3 = pnand %p1072_p0, %p258_p2 }
   0x6   : > { %p299_p4 = scmp.lt.s32.totalorder (!%p259_p3), %s1199_s24, 1  ;;  %v1209_v0 = vmov (!%p259_p3), 0.0   ;;  %v1210_v1 = vmov (!%p259_p3), 0   ;;  %v330_v2 = vld [vmem:[%s1499_s2] sm:$0xff] (!%p259_p3)  ;;  %v332_v3 = vld [vmem:[%s1499_s2 + $0x10] sm:$0xff] (!%p259_p3)  ;;  %v331_v4 = vld [vmem:[%s1499_s2 + $0x8] sm:$0xff] (!%p259_p3) }
   0x7   : > { %262 = sbr.rel (%p259_p3) target bundleno = 778 (0x30a), region = 48  ;;  %467 = vmatprep.mubr.f32.mxu0 (!%p259_p3), %v1209_v0  ;;  %757 = vmatprep.mubr.f32.mxu1 (!%p259_p3), %v1209_v0  ;;  %v333_v5 = vld [vmem:[%s1499_s2 + $0x18] sm:$0xff] (!%p259_p3)  ;;  %v334_v12 = vld [vmem:[%s1499_s2 + $0x20] sm:$0xff] (!%p259_p3)  ;;  %v335_v13 = vld [vmem:[%s1499_s2 + $0x28] sm:$0xff] (!%p259_p3)  ;;  %vm378_vm0 = vcmask (!%p259_p3), 130048   ;;  %vm644_vm1 = vcmask (!%p259_p3), 523264  }
   0x8   : > { %1183 = vset.pattern.permute.xlu0 (!%p259_p3), %v1210_v1  ;;  %1184 = vset.pattern.permute.xlu1 (!%p259_p3), %v1210_v1  ;;  %v322_v14 = vld [vmem:[%s1498_s1] sm:$0xff] (!%p259_p3)  ;;  %v336_v15 = vld [vmem:[%s1499_s2 + $0x30] sm:$0xff] (!%p259_p3)  ;;  %v337_v16 = vld [vmem:[%s1499_s2 + $0x38] sm:$0xff] (!%p259_p3) }
   0x9   : > { %340 = vperm.xlu0 (!%p259_p3), %1183, %v330_v2   ;;  %350 = vperm.xlu1 (!%p259_p3), %1184, %v332_v3   ;;  %v323_v17 = vld [vmem:[%s1498_s1 + $0x8] sm:$0xff] (!%p259_p3)  ;;  %v548_v18 = vld [vmem:[%s1501_s4] sm:$0xff] (!%p259_p3)  ;;  %v324_v20 = vld [vmem:[%s1498_s1 + $0x10] sm:$0xff] (!%p259_p3) }
   0xa   : > { %v549_v19 = vld [vmem:[%s1501_s4 + $0x8] sm:$0xff] (!%p259_p3)  ;;  %v550_v21 = vld [vmem:[%s1501_s4 + $0x10] sm:$0xff] (!%p259_p3)  ;;  %v551_v22 = vld [vmem:[%s1501_s4 + $0x18] sm:$0xff] (!%p259_p3) }
   0xb   : > { %v325_v23 = vld [vmem:[%s1498_s1 + $0x18] sm:$0xff] (!%p259_p3)  ;;  %v552_v24 = vld [vmem:[%s1501_s4 + $0x20] sm:$0xff] (!%p259_p3)  ;;  %v553_v25 = vld [vmem:[%s1501_s4 + $0x28] sm:$0xff] (!%p259_p3) }
   0xc   : > { %v326_v26 = vld [vmem:[%s1498_s1 + $0x20] sm:$0xff] (!%p259_p3)  ;;  %v554_v27 = vld [vmem:[%s1501_s4 + $0x30] sm:$0xff] (!%p259_p3)  ;;  %v555_v28 = vld [vmem:[%s1501_s4 + $0x38] sm:$0xff] (!%p259_p3) }
   0xd   : > { %345 = vperm.xlu0 (!%p259_p3), %1183, %v331_v4   ;;  %355 = vperm.xlu1 (!%p259_p3), %1184, %v333_v5   ;;  %v327_v29 = vld [vmem:[%s1498_s1 + $0x28] sm:$0xff] (!%p259_p3)  ;;  %v556_v30 = vld [vmem:[%s1501_s4 + $0x40] sm:$0xff] (!%p259_p3)  ;;  %v328_v32 = vld [vmem:[%s1498_s1 + $0x30] sm:$0xff] (!%p259_p3) }
   0xe   : > { %s1510_s24 = smov (!%p299_p4, %s1199_s24), 1  ;;  %v557_v31 = vld [vmem:[%s1501_s4 + $0x48] sm:$0xff]  ;;  %v558_v33 = vld [vmem:[%s1501_s4 + $0x50] sm:$0xff]  ;;  %v559_v34 = vld [vmem:[%s1501_s4 + $0x58] sm:$0xff] }
   0xf   : > { %s1103_s9 = sshll.u32 %s1510_s24, 5  ;;  %v329_v35 = vld [vmem:[%s1498_s1 + $0x38] sm:$0xff]  ;;  %v560_v36 = vld [vmem:[%s1501_s4 + $0x60] sm:$0xff]  ;;  %v561_v37 = vld [vmem:[%s1501_s4 + $0x68] sm:$0xff] }
  0x10   : > { %s306_s14 = scalar_lea.vmem %s1497_s0, %s1103_s9  ;;  %v562_v38 = vld [vmem:[%s1501_s4 + $0x70] sm:$0xff]  ;;  %v563_v39 = vld [vmem:[%s1501_s4 + $0x78] sm:$0xff]  ;;  %v888_v40 = vld [vmem:[%s1503_s6] sm:$0xff]  ;;  %s316_s29 = scalar_lea.vmem %s1504_s7, %s1103_s9 }
  0x11   : > { %v319_v6 = vld [vmem:[%s306_s14 + $0x8] sm:$0xff]  ;;  %v321_v7 = vld [vmem:[%s306_s14 + $0x18] sm:$0xff]  ;;  %v318_v8 = vld [vmem:[%s306_s14] sm:$0xff]  ;;  %360 = vperm.xlu0 %1183, %v334_v12   ;;  %365 = vperm.xlu1 %1184, %v335_v13  }
  0x12   : > { %v1105_v9 = vpack.c.bf16 %v321_v7, %v319_v6  ;;  %v320_v10 = vld [vmem:[%s306_s14 + $0x10] sm:$0xff]  ;;  %v889_v41 = vld [vmem:[%s1503_s6 + $0x8] sm:$0x3f] }
  0x13   : > { %v1107_v11 = vpack.c.bf16 %v320_v10, %v318_v8 }
  0x14   : > { %1106 = vmatprep.subr.bf16.mxu0 %v1105_v9 }
  0x15   : > { %1108 = vmatpush1.bf16.msra.mxu0 %v1107_v11  ;;  %370 = vperm.xlu0 %1183, %v336_v15  }
  0x16   : > { %375 = vperm.xlu1 %1184, %v337_v16  }
  0x18   : > { %1077 = vmatmul.mubr.msk.f32.vlgmr.msra.gmra.mrb[0].mxu0 %vm378_vm0, %v322_v14 }
  0x19   : > { %473 = vmatprep.mubr.f32.mxu0 %v1209_v0  ;;  %566 = vperm.xlu0 %1183, %v548_v18  }
  0x1a   : > { %571 = vperm.xlu1 %1184, %v549_v19  }
  0x1c   : > { %1078 = vmatmul.mubr.msk.f32.gmra.mrb[2].mxu0 %vm378_vm0, %v323_v17 }
  0x1d   : > { %479 = vmatprep.mubr.f32.mxu0 %v1209_v0  ;;  %576 = vperm.xlu0 %1183, %v550_v21  }
  0x1e   : > { %581 = vperm.xlu1 %1184, %v551_v22  }
  0x20   : > { %1079 = vmatmul.mubr.msk.f32.gmra.mrb[4].mxu0 %vm378_vm0, %v324_v20 }
  0x21   : > { %485 = vmatprep.mubr.f32.mxu0 %v1209_v0  ;;  %586 = vperm.xlu0 %1183, %v552_v24  }
  0x22   : > { %591 = vperm.xlu1 %1184, %v553_v25  }
  0x24   : > { %1080 = vmatmul.mubr.msk.f32.gmra.mrb[6].mxu0 %vm378_vm0, %v325_v23 }
  0x25   : > { %491 = vmatprep.mubr.f32.mxu0 %v1209_v0  ;;  %596 = vperm.xlu0 %1183, %v554_v27  }
  0x26   : > { %601 = vperm.xlu1 %1184, %v555_v28  }
  0x28   : > { %1081 = vmatmul.mubr.msk.f32.gmra.mrb[8].mxu0 %vm378_vm0, %v326_v26 }
  0x29   : > { %497 = vmatprep.mubr.f32.mxu0 %v1209_v0  ;;  %606 = vperm.xlu0 %1183, %v556_v30  }
  0x2a   : > { %611 = vperm.xlu1 %1184, %v557_v31  }
  0x2c   : > { %1082 = vmatmul.mubr.msk.f32.gmra.mrb[10].mxu0 %vm378_vm0, %v327_v29 }
  0x2d   : > { %503 = vmatprep.mubr.f32.mxu0 %v1209_v0  ;;  %616 = vperm.xlu0 %1183, %v558_v33  }
  0x2e   : > { %621 = vperm.xlu1 %1184, %v559_v34  }
  0x30   : > { %1083 = vmatmul.mubr.msk.f32.gmra.mrb[12].mxu0 %vm378_vm0, %v328_v32 }
  0x31   : > { %509 = vmatprep.mubr.f32.mxu0 %v1209_v0  ;;  %626 = vperm.xlu0 %1183, %v560_v36  }
  0x32   : > { %631 = vperm.xlu1 %1184, %v561_v37  }
  0x34   : > { %1084 = vmatmul.mubr.msk.f32.gmra.mrb[14].mxu0 %vm378_vm0, %v329_v35 }
  0x35   : > { %964 = vmatprep.mubr.f32.mxu0 %v1209_v0  ;;  %636 = vperm.xlu0 %1183, %v562_v38  }
  0x36   : > { %641 = vperm.xlu1 %1184, %v563_v39  }
  0x39   : > { %892 = vperm.xlu0 %1183, %v888_v40  }
  0x3a   : > { %897 = vperm.xlu1 %1184, %v889_v41  }
  0x88   : > { %v341_v42 = vpop.permute.xlu0 %340  ;;  %v351_v51 = vpop.permute.xlu1 %350 }
  0x8c   : > { %v346_v46 = vpop.permute.xlu0 %345  ;;  %v356_v62 = vpop.permute.xlu1 %355 }
  0x90   : > { %v361_v12 = vpop.permute.xlu0 %360  ;;  %v366_v15 = vpop.permute.xlu1 %365 }
  0x94   : > { %v371_v28 = vpop.permute.xlu0 %370 }
  0x95   : > { %v376_v31 = vpop.permute.xlu1 %375 }
  0xeb   : > { %v469_v43 = vpop.f32.mrb[0].mxu0 }
  0xec   : > { %v471_v44 = vpop.f32.mrb[1].mxu0  ;;  %v470_v45 = vadd.f32 %v469_v43, %v341_v42  ;;  %v532_v43 = vld [vmem:[%s1500_s3] sm:$0xff] }
  0xed   : > { %v472_v47 = vadd.f32 %v471_v44, %v341_v42  ;;  %v533_v44 = vld [vmem:[%s1500_s3 + $0x8] sm:$0xff] }
  0xee   : > { %v516_v53 = vmax.f32 %v470_v45, 0.0  ;;  %v534_v45 = vld [vmem:[%s1500_s3 + $0x10] sm:$0xff] }
  0xef   : > { %v475_v48 = vpop.f32.mrb[2].mxu0  ;;  %v517_v55 = vmax.f32 %v472_v47, 0.0  ;;  %v536_v47 = vld [vmem:[%s1500_s3 + $0x20] sm:$0xff] }
  0xf0   : > { %v476_v49 = vadd.f32 %v475_v48, %v346_v46  ;;  %v477_v50 = vpop.f32.mrb[3].mxu0  ;;  %v537_v48 = vld [vmem:[%s1500_s3 + $0x28] sm:$0xff] }
  0xf1   : > { %v478_v52 = vadd.f32 %v477_v50, %v346_v46  ;;  %v535_v46 = vld [vmem:[%s1500_s3 + $0x18] sm:$0xff] }
  0xf2   : > { %v518_v54 = vmax.f32 %v476_v49, 0.0  ;;  %v538_v49 = vld [vmem:[%s1500_s3 + $0x30] sm:$0xff]  ;;  %v539_v50 = vld [vmem:[%s1500_s3 + $0x38] sm:$0xff] }
  0xf3   : > { %v519_v56 = vmax.f32 %v478_v52, 0.0  ;;  %v481_v57 = vpop.f32.mrb[4].mxu0  ;;  %v541_v52 = vld [vmem:[%s1500_s3 + $0x48] sm:$0xff] }
  0xf4   : > { %v483_v58 = vpop.f32.mrb[5].mxu0  ;;  %v1111_v59 = vpack.c.bf16 %v518_v54, %v516_v53  ;;  %v482_v61 = vadd.f32 %v481_v57, %v351_v51  ;;  %v542_v53 = vld [vmem:[%s1500_s3 + $0x50] sm:$0xff]  ;;  %v543_v54 = vld [vmem:[%s1500_s3 + $0x58] sm:$0xff] }
  0xf5   : > { %v1109_v60 = vpack.c.bf16 %v519_v56, %v517_v55  ;;  %v484_v63 = vadd.f32 %v483_v58, %v351_v51  ;;  %v540_v51 = vld [vmem:[%s1500_s3 + $0x40] sm:$0xff]  ;;  %v545_v56 = vld [vmem:[%s1500_s3 + $0x68] sm:$0xff]  ;;  %v546_v57 = vld [vmem:[%s1500_s3 + $0x70] sm:$0xff] }
  0xf6   : > { %v520_v5 = vmax.f32 %v482_v61, 0.0  ;;  %v544_v55 = vld [vmem:[%s1500_s3 + $0x60] sm:$0xff]  ;;  %v547_v58 = vld [vmem:[%s1500_s3 + $0x78] sm:$0xff]  ;;  %v567_v61 = vpop.permute.xlu0 %566 }
  0xf7   : > { %v487_v1 = vpop.f32.mrb[6].mxu0  ;;  %1110 = vmatprep.subr.bf16.mxu1 %v1109_v60  ;;  %v521_v7 = vmax.f32 %v484_v63, 0.0  ;;  %v572_v63 = vpop.permute.xlu1 %571 }
  0xf8   : > { %v488_v2 = vadd.f32 %v487_v1, %v356_v62  ;;  %v489_v3 = vpop.f32.mrb[7].mxu0  ;;  %1112 = vmatpush1.bf16.msra.mxu1 %v1111_v59 }
  0xf9   : > { %v490_v4 = vadd.f32 %v489_v3, %v356_v62 }
  0xfa   : > { %v522_v6 = vmax.f32 %v488_v2, 0.0 }
  0xfb   : > { %v523_v8 = vmax.f32 %v490_v4, 0.0  ;;  %v493_v9 = vpop.f32.mrb[8].mxu0 }
  0xfc   : > { %v1115_v10 = vpack.c.bf16 %v522_v6, %v520_v5  ;;  %v495_v11 = vpop.f32.mrb[9].mxu0  ;;  %v494_v14 = vadd.f32 %v493_v9, %v361_v12 }
  0xfd   : > { %v1113_v13 = vpack.c.bf16 %v523_v8, %v521_v7  ;;  %v496_v16 = vadd.f32 %v495_v11, %v361_v12 }
  0xfe   : > { %v524_v21 = vmax.f32 %v494_v14, 0.0 }
  0xff   : > { %v499_v17 = vpop.f32.mrb[10].mxu0  ;;  %1114 = vmatprep.subr.bf16.mxu1 %v1113_v13  ;;  %v525_v23 = vmax.f32 %v496_v16, 0.0  ;;  %v577_v13 = vpop.permute.xlu0 %576 }
 0x100   : > { %v500_v18 = vadd.f32 %v499_v17, %v366_v15  ;;  %v501_v19 = vpop.f32.mrb[11].mxu0  ;;  %1116 = vmatpush1.bf16.msra.mxu1 %v1115_v10  ;;  %v582_v16 = vpop.permute.xlu1 %581 }
 0x101   : > { %v502_v20 = vadd.f32 %v501_v19, %v366_v15 }
 0x102   : > { %v526_v22 = vmax.f32 %v500_v18, 0.0 }
 0x103   : > { %v527_v24 = vmax.f32 %v502_v20, 0.0  ;;  %v505_v25 = vpop.f32.mrb[12].mxu0 }
 0x104   : > { %v1119_v26 = vpack.c.bf16 %v526_v22, %v524_v21  ;;  %v507_v27 = vpop.f32.mrb[13].mxu0  ;;  %v506_v30 = vadd.f32 %v505_v25, %v371_v28 }
 0x105   : > { %v1117_v29 = vpack.c.bf16 %v527_v24, %v525_v23  ;;  %v508_v32 = vadd.f32 %v507_v27, %v371_v28 }
 0x106   : > { %v528_v37 = vmax.f32 %v506_v30, 0.0 }
 0x107   : > { %v511_v33 = vpop.f32.mrb[14].mxu0  ;;  %1118 = vmatprep.subr.bf16.mxu1 %v1117_v29  ;;  %v529_v39 = vmax.f32 %v508_v32, 0.0  ;;  %v587_v29 = vpop.permute.xlu0 %586 }
 0x108   : > { %v512_v34 = vadd.f32 %v511_v33, %v376_v31  ;;  %v513_v35 = vpop.f32.mrb[15].mxu0  ;;  %1120 = vmatpush1.bf16.msra.mxu1 %v1119_v26  ;;  %v592_v32 = vpop.permute.xlu1 %591 }
 0x109   : > { %v514_v36 = vadd.f32 %v513_v35, %v376_v31 }
 0x10a   : > { %v530_v38 = vmax.f32 %v512_v34, 0.0 }
 0x10b   : > { %v531_v40 = vmax.f32 %v514_v36, 0.0 }
 0x10c   : > { %v1123_v41 = vpack.c.bf16 %v530_v38, %v528_v37 }
 0x10d   : > { %v1121_v42 = vpack.c.bf16 %v531_v40, %v529_v39 }
 0x10f   : > { %1122 = vmatprep.subr.bf16.mxu1 %v1121_v42 }
 0x110   : > { %1124 = vmatpush1.bf16.msra.mxu1 %v1123_v41 }
 0x113   : > { %1085 = vmatmul.mubr.msk.f32.vlgmr.msra.gmra.mrb[0].mxu1 %vm644_vm1, %v532_v43 }
 0x114   : > { %763 = vmatprep.mubr.f32.mxu1 %v1209_v0 }
 0x117   : > { %1086 = vmatmul.mubr.msk.f32.gmra.mrb[2].mxu1 %vm644_vm1, %v533_v44 }
 0x118   : > { %769 = vmatprep.mubr.f32.mxu1 %v1209_v0 }
 0x11b   : > { %1087 = vmatmul.mubr.msk.f32.gmra.mrb[4].mxu1 %vm644_vm1, %v534_v45  ;;  %v597_v45 = vpop.permute.xlu0 %596 }
 0x11c   : > { %775 = vmatprep.mubr.f32.mxu1 %v1209_v0 }
 0x11f   : > { %1088 = vmatmul.mubr.msk.f32.gmra.mrb[6].mxu1 %vm644_vm1, %v535_v46 }
 0x120   : > { %781 = vmatprep.mubr.f32.mxu1 %v1209_v0 }
 0x123   : > { %1089 = vmatmul.mubr.msk.f32.gmra.mrb[8].mxu1 %vm644_vm1, %v536_v47 }
 0x124   : > { %787 = vmatprep.mubr.f32.mxu1 %v1209_v0 }
 0x127   : > { %1090 = vmatmul.mubr.msk.f32.gmra.mrb[10].mxu1 %vm644_vm1, %v537_v48  ;;  %v602_v48 = vpop.permute.xlu1 %601 }
 0x128   : > { %793 = vmatprep.mubr.f32.mxu1 %v1209_v0 }
 0x12b   : > { %1091 = vmatmul.mubr.msk.f32.gmra.mrb[12].mxu1 %vm644_vm1, %v538_v49 }
 0x12c   : > { %799 = vmatprep.mubr.f32.mxu1 %v1209_v0 }
 0x12f   : > { %1092 = vmatmul.mubr.msk.f32.gmra.mrb[14].mxu1 %vm644_vm1, %v539_v50 }
 0x130   : > { %805 = vmatprep.mubr.f32.mxu1 %v1209_v0 }
 0x133   : > { %1093 = vmatmul.mubr.msk.f32.gmra.mrb[16].mxu1 %vm644_vm1, %v540_v51 }
 0x134   : > { %811 = vmatprep.mubr.f32.mxu1 %v1209_v0 }
 0x137   : > { %1094 = vmatmul.mubr.msk.f32.gmra.mrb[18].mxu1 %vm644_vm1, %v541_v52 }
 0x138   : > { %817 = vmatprep.mubr.f32.mxu1 %v1209_v0 }
 0x13b   : > { %1095 = vmatmul.mubr.msk.f32.gmra.mrb[20].mxu1 %vm644_vm1, %v542_v53 }
 0x13c   : > { %823 = vmatprep.mubr.f32.mxu1 %v1209_v0 }
 0x13f   : > { %1096 = vmatmul.mubr.msk.f32.gmra.mrb[22].mxu1 %vm644_vm1, %v543_v54 }
 0x140   : > { %829 = vmatprep.mubr.f32.mxu1 %v1209_v0 }
 0x143   : > { %1097 = vmatmul.mubr.msk.f32.gmra.mrb[24].mxu1 %vm644_vm1, %v544_v55 }
 0x144   : > { %835 = vmatprep.mubr.f32.mxu1 %v1209_v0 }
 0x147   : > { %1098 = vmatmul.mubr.msk.f32.gmra.mrb[26].mxu1 %vm644_vm1, %v545_v56 }
 0x148   : > { %841 = vmatprep.mubr.f32.mxu1 %v1209_v0 }
 0x14b   : > { %1099 = vmatmul.mubr.msk.f32.gmra.mrb[28].mxu1 %vm644_vm1, %v546_v57 }
 0x14c   : > { %847 = vmatprep.mubr.f32.mxu1 %v1209_v0 }
 0x14f   : > { %1100 = vmatmul.mubr.msk.f32.gmra.mrb[30].mxu1 %vm644_vm1, %v547_v58 }
 0x1e6   : > { %v759_v59 = vpop.f32.mrb[0].mxu1 }
 0x1e7   : > { %v761_v60 = vpop.f32.mrb[1].mxu1  ;;  %v760_v62 = vadd.f32 %v759_v59, %v567_v61 }
 0x1e8   : > { %v762_v1 = vadd.f32 %v761_v60, %v567_v61  ;;  %v607_v61 = vpop.permute.xlu0 %606 }
 0x1e9   : > { %v854_v6 = vmax.f32 %v760_v62, 0.0 }
 0x1ea   : > { %v765_v2 = vpop.f32.mrb[2].mxu1  ;;  %v855_v8 = vmax.f32 %v762_v1, 0.0  ;;  %v612_v1 = vpop.permute.xlu1 %611 }
 0x1eb   : > { %v766_v3 = vadd.f32 %v765_v2, %v572_v63  ;;  %v767_v4 = vpop.f32.mrb[3].mxu1 }
 0x1ec   : > { %v768_v5 = vadd.f32 %v767_v4, %v572_v63 }
 0x1ed   : > { %v856_v7 = vmax.f32 %v766_v3, 0.0 }
 0x1ee   : > { %v857_v9 = vmax.f32 %v768_v5, 0.0  ;;  %v771_v10 = vpop.f32.mrb[4].mxu1 }
 0x1ef   : > { %v1127_v11 = vpack.c.bf16 %v856_v7, %v854_v6  ;;  %v773_v12 = vpop.f32.mrb[5].mxu1  ;;  %v772_v15 = vadd.f32 %v771_v10, %v577_v13 }
 0x1f0   : > { %v1125_v14 = vpack.c.bf16 %v857_v9, %v855_v8  ;;  %v774_v17 = vadd.f32 %v773_v12, %v577_v13 }
 0x1f1   : > { %v858_v22 = vmax.f32 %v772_v15, 0.0 }
 0x1f2   : > { %v777_v18 = vpop.f32.mrb[6].mxu1  ;;  %1126 = vmatprep.subr.bf16.mxu0 %v1125_v14  ;;  %v859_v24 = vmax.f32 %v774_v17, 0.0  ;;  %v617_v14 = vpop.permute.xlu0 %616 }
 0x1f3   : > { %v778_v19 = vadd.f32 %v777_v18, %v582_v16  ;;  %v779_v20 = vpop.f32.mrb[7].mxu1  ;;  %1128 = vmatpush1.bf16.msra.mxu0 %v1127_v11  ;;  %v622_v17 = vpop.permute.xlu1 %621 }
 0x1f4   : > { %v780_v21 = vadd.f32 %v779_v20, %v582_v16 }
 0x1f5   : > { %v860_v23 = vmax.f32 %v778_v19, 0.0 }
 0x1f6   : > { %v861_v25 = vmax.f32 %v780_v21, 0.0  ;;  %v783_v26 = vpop.f32.mrb[8].mxu1 }
 0x1f7   : > { %v1131_v27 = vpack.c.bf16 %v860_v23, %v858_v22  ;;  %v785_v28 = vpop.f32.mrb[9].mxu1  ;;  %v784_v31 = vadd.f32 %v783_v26, %v587_v29 }
 0x1f8   : > { %v1129_v30 = vpack.c.bf16 %v861_v25, %v859_v24  ;;  %v786_v33 = vadd.f32 %v785_v28, %v587_v29 }
 0x1f9   : > { %v862_v38 = vmax.f32 %v784_v31, 0.0 }
 0x1fa   : > { %v789_v34 = vpop.f32.mrb[10].mxu1  ;;  %1130 = vmatprep.subr.bf16.mxu0 %v1129_v30  ;;  %v863_v40 = vmax.f32 %v786_v33, 0.0  ;;  %v627_v30 = vpop.permute.xlu0 %626 }
 0x1fb   : > { %v790_v35 = vadd.f32 %v789_v34, %v592_v32  ;;  %v791_v36 = vpop.f32.mrb[11].mxu1  ;;  %1132 = vmatpush1.bf16.msra.mxu0 %v1131_v27  ;;  %v632_v33 = vpop.permute.xlu1 %631 }
 0x1fc   : > { %v792_v37 = vadd.f32 %v791_v36, %v592_v32 }
 0x1fd   : > { %v864_v39 = vmax.f32 %v790_v35, 0.0 }
 0x1fe   : > { %v865_v41 = vmax.f32 %v792_v37, 0.0  ;;  %v795_v42 = vpop.f32.mrb[12].mxu1 }
 0x1ff   : > { %v1135_v43 = vpack.c.bf16 %v864_v39, %v862_v38  ;;  %v797_v44 = vpop.f32.mrb[13].mxu1  ;;  %v796_v47 = vadd.f32 %v795_v42, %v597_v45 }
 0x200   : > { %v1133_v46 = vpack.c.bf16 %v865_v41, %v863_v40  ;;  %v798_v49 = vadd.f32 %v797_v44, %v597_v45 }
 0x201   : > { %v866_v54 = vmax.f32 %v796_v47, 0.0 }
 0x202   : > { %v801_v50 = vpop.f32.mrb[14].mxu1  ;;  %1134 = vmatprep.subr.bf16.mxu0 %v1133_v46  ;;  %v867_v56 = vmax.f32 %v798_v49, 0.0  ;;  %v637_v46 = vpop.permute.xlu0 %636 }
 0x203   : > { %v802_v51 = vadd.f32 %v801_v50, %v602_v48  ;;  %v803_v52 = vpop.f32.mrb[15].mxu1  ;;  %1136 = vmatpush1.bf16.msra.mxu0 %v1135_v43  ;;  %v642_v49 = vpop.permute.xlu1 %641 }
 0x204   : > { %v804_v53 = vadd.f32 %v803_v52, %v602_v48 }
 0x205   : > { %v868_v55 = vmax.f32 %v802_v51, 0.0 }
 0x206   : > { %v869_v57 = vmax.f32 %v804_v53, 0.0  ;;  %v807_v58 = vpop.f32.mrb[16].mxu1 }
 0x207   : > { %v1139_v59 = vpack.c.bf16 %v868_v55, %v866_v54  ;;  %v809_v60 = vpop.f32.mrb[17].mxu1  ;;  %v808_v63 = vadd.f32 %v807_v58, %v607_v61 }
 0x208   : > { %v1137_v62 = vpack.c.bf16 %v869_v57, %v867_v56  ;;  %v810_v2 = vadd.f32 %v809_v60, %v607_v61  ;;  %v886_v61 = vld [vmem:[%s1502_s5] sm:$0xff] }
 0x209   : > { %v870_v7 = vmax.f32 %v808_v63, 0.0  ;;  %v893_v63 = vpop.permute.xlu0 %892 }
 0x20a   : > { %v813_v3 = vpop.f32.mrb[18].mxu1  ;;  %1138 = vmatprep.subr.bf16.mxu0 %v1137_v62  ;;  %v871_v9 = vmax.f32 %v810_v2, 0.0  ;;  %v887_v62 = vld [vmem:[%s1502_s5 + $0x8] sm:$0x3f] }
 0x20b   : > { %v814_v4 = vadd.f32 %v813_v3, %v612_v1  ;;  %v815_v5 = vpop.f32.mrb[19].mxu1  ;;  %1140 = vmatpush1.bf16.msra.mxu0 %v1139_v59 }
 0x20c   : > { %v816_v6 = vadd.f32 %v815_v5, %v612_v1  ;;  %v898_v5 = vpop.permute.xlu1 %897 }
 0x20d   : > { %v872_v8 = vmax.f32 %v814_v4, 0.0 }
 0x20e   : > { %v873_v10 = vmax.f32 %v816_v6, 0.0  ;;  %v819_v11 = vpop.f32.mrb[20].mxu1 }
 0x20f   : > { %v1143_v12 = vpack.c.bf16 %v872_v8, %v870_v7  ;;  %v821_v13 = vpop.f32.mrb[21].mxu1  ;;  %v820_v16 = vadd.f32 %v819_v11, %v617_v14 }
 0x210   : > { %v1141_v15 = vpack.c.bf16 %v873_v10, %v871_v9  ;;  %v822_v18 = vadd.f32 %v821_v13, %v617_v14 }
 0x211   : > { %v874_v23 = vmax.f32 %v820_v16, 0.0 }
 0x212   : > { %v825_v19 = vpop.f32.mrb[22].mxu1  ;;  %1142 = vmatprep.subr.bf16.mxu0 %v1141_v15  ;;  %v875_v25 = vmax.f32 %v822_v18, 0.0 }
 0x213   : > { %v826_v20 = vadd.f32 %v825_v19, %v622_v17  ;;  %v827_v21 = vpop.f32.mrb[23].mxu1  ;;  %1144 = vmatpush1.bf16.msra.mxu0 %v1143_v12 }
 0x214   : > { %v828_v22 = vadd.f32 %v827_v21, %v622_v17 }
 0x215   : > { %v876_v24 = vmax.f32 %v826_v20, 0.0 }
 0x216   : > { %v877_v26 = vmax.f32 %v828_v22, 0.0  ;;  %v831_v27 = vpop.f32.mrb[24].mxu1 }
 0x217   : > { %v1147_v28 = vpack.c.bf16 %v876_v24, %v874_v23  ;;  %v833_v29 = vpop.f32.mrb[25].mxu1  ;;  %v832_v32 = vadd.f32 %v831_v27, %v627_v30 }
 0x218   : > { %v1145_v31 = vpack.c.bf16 %v877_v26, %v875_v25  ;;  %v834_v34 = vadd.f32 %v833_v29, %v627_v30 }
 0x219   : > { %v878_v39 = vmax.f32 %v832_v32, 0.0 }
 0x21a   : > { %v837_v35 = vpop.f32.mrb[26].mxu1  ;;  %1146 = vmatprep.subr.bf16.mxu0 %v1145_v31  ;;  %v879_v41 = vmax.f32 %v834_v34, 0.0 }
 0x21b   : > { %v838_v36 = vadd.f32 %v837_v35, %v632_v33  ;;  %v839_v37 = vpop.f32.mrb[27].mxu1  ;;  %1148 = vmatpush1.bf16.msra.mxu0 %v1147_v28 }
 0x21c   : > { %v840_v38 = vadd.f32 %v839_v37, %v632_v33 }
 0x21d   : > { %v880_v40 = vmax.f32 %v838_v36, 0.0 }
 0x21e   : > { %v881_v42 = vmax.f32 %v840_v38, 0.0  ;;  %v843_v43 = vpop.f32.mrb[28].mxu1 }
 0x21f   : > { %v1151_v44 = vpack.c.bf16 %v880_v40, %v878_v39  ;;  %v845_v45 = vpop.f32.mrb[29].mxu1  ;;  %v844_v48 = vadd.f32 %v843_v43, %v637_v46 }
 0x220   : > { %v1149_v47 = vpack.c.bf16 %v881_v42, %v879_v41  ;;  %v846_v50 = vadd.f32 %v845_v45, %v637_v46 }
 0x221   : > { %v882_v55 = vmax.f32 %v844_v48, 0.0 }
 0x222   : > { %v849_v51 = vpop.f32.mrb[30].mxu1  ;;  %1150 = vmatprep.subr.bf16.mxu0 %v1149_v47  ;;  %v883_v57 = vmax.f32 %v846_v50, 0.0 }
 0x223   : > { %v850_v52 = vadd.f32 %v849_v51, %v642_v49  ;;  %v851_v53 = vpop.f32.mrb[31].mxu1  ;;  %1152 = vmatpush1.bf16.msra.mxu0 %v1151_v44 }
 0x224   : > { %v852_v54 = vadd.f32 %v851_v53, %v642_v49 }
 0x225   : > { %v884_v56 = vmax.f32 %v850_v52, 0.0 }
 0x226   : > { %v885_v58 = vmax.f32 %v852_v54, 0.0 }
 0x227   : > { %v1155_v59 = vpack.c.bf16 %v884_v56, %v882_v55 }
 0x228   : > { %v1153_v60 = vpack.c.bf16 %v885_v58, %v883_v57 }
 0x22a   : > { %1154 = vmatprep.subr.bf16.mxu0 %v1153_v60 }
 0x22b   : > { %1156 = vmatpush1.bf16.msra.mxu0 %v1155_v59 }
 0x22e   : > { %965 = vmatmul.mubr.f32.vlgmr.msra.gmra.mrb[16].mxu0 %v886_v61 }
 0x22f   : > { %970 = vmatprep.mubr.f32.mxu0 %v1209_v0 }
 0x232   : > { %971 = vmatmul.mubr.f32.gmra.mrb[18].mxu0 %v887_v62 }
 0x301   : > { %v966_v1 = vpop.f32.mrb[16].mxu0 }
 0x302   : > { %v967_v2 = vadd.f32 %v966_v1, %v893_v63  ;;  %v968_v3 = vpop.f32.mrb[17].mxu0 }
 0x303   : > { %v969_v4 = vadd.f32 %v968_v3, %v893_v63 }
 0x304   : > { %977 = vst [vmem:[%s316_s29] sm:$0xff] %v967_v2 }
 0x305   : > { %978 = vst [vmem:[%s316_s29 + $0x8] sm:$0xff] %v969_v4  ;;  %v972_v6 = vpop.f32.mrb[18].mxu0 }
 0x306   : > { %v973_v0 = vadd.f32 %v972_v6, %v898_v5  ;;  %v974_v7 = vpop.f32.mrb[19].mxu0 }
 0x307   : > { %v975_v8 = vadd.f32 %v974_v7, %v898_v5 }
 0x308   : > { %979 = vst [vmem:[%s316_s29 + $0x10] sm:$0x3f] %v973_v0 }
 0x309   : > { %980 = vst [vmem:[%s316_s29 + $0x18] sm:$0x3f] %v975_v8 }
 0x30a PF: > { %s17_s26 = sadd.s32 1, %s1207_s26   ;;  %s1505_s24 = smov %s1203_s25 }
 0x30b   : > { %p14_p5 = scmp.ge.s32.totalorder %s17_s26, 4   ;;  %s1506_s25 = smov %s1508_s27 }
 0x30d   :  { %16 = sbr.rel (!%p14_p5) target bundleno = 2 (0x2), region = 78 }

</bundles_post_ra>
